<compile_context>
chip_gen: v7x
topology: tpu7x:2x2x1
jax: 0.10.0
libtpu: 0.0.40
codegen_flags: <defaults>
</compile_context>

<pallas_src>
import functools

import jax
import jax.numpy as jnp
from jax.experimental import pallas as pl
from jax.experimental.pallas import tpu as pltpu

_LANES = 128              # batch columns padded to a multiple of the lane width
_MAX_BLOCK = 8192         # max batch columns per grid step (v7x-safe; sweep up to 16384 on v5e/v6e)
_MIN_SPLIT = 1024         # if one block would cover everything but n >= this, use 2 blocks (v7x: 2 TCs)
_PALLAS_MIN_ROWS = 1024   # below this, use the plain XLA path (launch + pad overhead dominates)
_VMEM_LIMIT = 32 * 1024 * 1024


def _round_up(x, m):
    return (x + m - 1) // m * m


def _make_kernel(obs_dim, act_dim, hidden):
    """Fused 4-layer MLP, feature-major: activations are (features, n_block).

    bf16 MXU operands (no f32 emulation passes); bias add / ReLU / accumulate in f32.
    """
    H = hidden
    r_w1a, r_w1b, r_w2, r_w3, r_w4 = 0, H, 2 * H, 3 * H, 4 * H
    r_b1, r_b2, r_b3, r_b4 = 4 * H + 8, 5 * H + 8, 6 * H + 8, 7 * H + 8

    def kernel(obs_ref, act_ref, p_ref, out_ref):
        obs_t = obs_ref[...]                                   # (obs_dim, NB) bf16
        act_t = act_ref[...]                                   # (act_dim, NB) bf16

        # Static, 8-aligned views into the single packed f32 parameter buffer.
        # Weight views (<= (H,H)) are cast to bf16 so every dot runs native bf16 on the MXU.
        w1a = p_ref[r_w1a:r_w1a + H, 0:obs_dim].astype(jnp.bfloat16)   # (H, obs_dim)
        w1b = p_ref[r_w1b:r_w1b + H, 0:act_dim].astype(jnp.bfloat16)   # (H, act_dim)
        w2 = p_ref[r_w2:r_w2 + H, :].astype(jnp.bfloat16)              # (H, H)
        w3 = p_ref[r_w3:r_w3 + H, :].astype(jnp.bfloat16)              # (H, H)
        w4 = p_ref[r_w4:r_w4 + 1, :].astype(jnp.bfloat16)              # (1, H)
        b1 = p_ref[r_b1:r_b1 + H, 0:1]                                 # (H, 1) f32
        b2 = p_ref[r_b2:r_b2 + H, 0:1]
        b3 = p_ref[r_b3:r_b3 + H, 0:1]
        b4 = p_ref[r_b4:r_b4 + 1, 0:1]                                 # (1, 1)

        # Layer 1 with the obs/act concat fused:  (x @ W1)^T = W1a^T obs^T + W1b^T act^T
        h = (jnp.dot(w1a, obs_t, preferred_element_type=jnp.float32)
             + jnp.dot(w1b, act_t, preferred_element_type=jnp.float32)
             + b1)
        h = jnp.maximum(h, 0.0)
        h = jnp.maximum(
            jnp.dot(w2, h.astype(jnp.bfloat16), preferred_element_type=jnp.float32) + b2, 0.0)
        h = jnp.maximum(
            jnp.dot(w3, h.astype(jnp.bfloat16), preferred_element_type=jnp.float32) + b3, 0.0)
        q = jnp.dot(w4, h.astype(jnp.bfloat16), preferred_element_type=jnp.float32) + b4
        out_ref[...] = q.astype(out_ref.dtype)                 # (1, NB), lane-dense store

    return kernel


def pack_params(params, obs_dim, act_dim, hidden):
    """Pack all weights/biases into one (7H+16, H) f32 buffer (feature-major weights).

    Call ONCE per parameter update (not per forward) and pass the result to the forward.
    """
    H = hidden
    assert H % 8 == 0 and obs_dim <= H and act_dim <= H
    R = 7 * H + 16
    w1 = params["w1"].astype(jnp.float32)                      # (obs_dim+act_dim, H)
    P = jnp.zeros((R, H), jnp.float32)
    P = P.at[0:H, 0:obs_dim].set(w1[:obs_dim].T)               # W1a^T
    P = P.at[H:2 * H, 0:act_dim].set(w1[obs_dim:].T)           # W1b^T
    P = P.at[2 * H:3 * H, :].set(params["w2"].astype(jnp.float32).T)
    P = P.at[3 * H:4 * H, :].set(params["w3"].astype(jnp.float32).T)
    P = P.at[4 * H:4 * H + 1, :].set(params["w4"].astype(jnp.float32).T)   # (1, H)
    P = P.at[4 * H + 8:5 * H + 8, 0:1].set(params["b1"].astype(jnp.float32).reshape(H, 1))
    P = P.at[5 * H + 8:6 * H + 8, 0:1].set(params["b2"].astype(jnp.float32).reshape(H, 1))
    P = P.at[6 * H + 8:7 * H + 8, 0:1].set(params["b3"].astype(jnp.float32).reshape(H, 1))
    P = P.at[7 * H + 8:7 * H + 9, 0:1].set(params["b4"].astype(jnp.float32).reshape(1, 1))
    return P


def _pallas_forward_feature_major(obs_t, act_t, packed, n_valid):
    """obs_t: (obs_dim, N), act_t: (act_dim, N); returns (1, N_pad) f32 Q-values."""
    obs_dim, n_cols = obs_t.shape
    act_dim = act_t.shape[0]
    R, H = packed.shape

    # Block width / grid length: big blocks to amortize per-step overhead, but keep at
    # least 2 blocks when there is enough work so v7x can shard across both TensorCores.
    n128 = _round_up(max(n_cols, _LANES), _LANES)
    g = max(1, -(-n128 // _MAX_BLOCK))
    if g == 1 and n_valid >= _MIN_SPLIT and n128 >= 2 * _LANES:
        g = 2
    nb = _round_up(-(-n128 // g), _LANES)
    n_pad = nb * g

    obs_t = jnp.pad(obs_t.astype(jnp.bfloat16), ((0, 0), (0, n_pad - n_cols)))
    act_t = jnp.pad(act_t.astype(jnp.bfloat16), ((0, 0), (0, n_pad - n_cols)))

    flops = 2 * n_pad * H * (obs_dim + act_dim + 2 * H + 1)
    bytes_accessed = 2 * n_pad * (obs_dim + act_dim) + 4 * n_pad + 4 * R * H

    return pl.pallas_call(
        _make_kernel(obs_dim, act_dim, H),
        out_shape=jax.ShapeDtypeStruct((1, n_pad), jnp.float32),
        grid=(g,),
        in_specs=[
            pl.BlockSpec((obs_dim, nb), lambda i: (0, i)),
            pl.BlockSpec((act_dim, nb), lambda i: (0, i)),
            pl.BlockSpec((R, H), lambda i: (0, 0)),        # params resident across blocks
        ],
        out_specs=pl.BlockSpec((1, nb), lambda i: (0, i)),  # lane-dense output row
        compiler_params=pltpu.CompilerParams(
            dimension_semantics=("parallel",),
            vmem_limit_bytes=_VMEM_LIMIT),
        cost_estimate=pl.CostEstimate(
            flops=flops, transcendentals=0, bytes_accessed=bytes_accessed),
        # NOTE: with nb >= 8192, pipeline_mode=pl.Buffered(3) on the obs/act specs is a
        # worthwhile sweep if profiling shows exposed input-DMA latency.
    )(obs_t, act_t, packed)


def _dense_forward_from_packed(obs, act, packed, obs_dim, act_dim, H):
    """Plain XLA path for small batches (f32 throughout)."""
    w1a = packed[0:H, 0:obs_dim]
    w1b = packed[H:2 * H, 0:act_dim]
    w2 = packed[2 * H:3 * H, :]
    w3 = packed[3 * H:4 * H, :]
    w4 = packed[4 * H:4 * H + 1, :]
    b1 = packed[4 * H + 8:5 * H + 8, 0]
    b2 = packed[5 * H + 8:6 * H + 8, 0]
    b3 = packed[6 * H + 8:7 * H + 8, 0]
    b4 = packed[7 * H + 8, 0]
    h = jnp.maximum(obs @ w1a.T + act @ w1b.T + b1, 0.0)
    h = jnp.maximum(h @ w2.T + b2, 0.0)
    h = jnp.maximum(h @ w3.T + b3, 0.0)
    return h @ w4.T + b4                                     # (n, 1)


@functools.partial(jax.jit, static_argnames=("use_pallas",))
def qnetwork_forward(obs, act, packed, use_pallas=None):
    """QNetwork.forward.

    obs: (N, obs_dim) or (B, S, obs_dim) float32
    act: (N, act_dim) or (B, S, act_dim) float32
    packed: output of pack_params() (built once per parameter update)
    returns: (N, 1) or (B, S, 1) float32
    """
    reshape = obs.ndim == 3
    if reshape:
        batch_size, seq_len, _ = obs.shape
        obs = obs.reshape(-1, obs.shape[-1])
        act = act.reshape(-1, act.shape[-1])

    n, obs_dim = obs.shape
    act_dim = act.shape[-1]
    H = packed.shape[1]

    if use_pallas is None:
        use_pallas = n >= _PALLAS_MIN_ROWS

    if use_pallas:
        # Batch on the lane axis.  cast->bf16 + transpose + pad fuse into one (half-width)
        # XLA copy.  Pipelines that can store replay batches feature-major should call
        # qnetwork_forward_feature_major() and skip this pass entirely.
        obs_t = obs.astype(jnp.bfloat16).T
        act_t = act.astype(jnp.bfloat16).T
        q_t = _pallas_forward_feature_major(obs_t, act_t, packed, n)
        q = q_t[0, :n].reshape(n, 1)
    else:
        q = _dense_forward_from_packed(obs.astype(jnp.float32), act.astype(jnp.float32),
                                       packed, obs_dim, act_dim, H)

    if reshape:
        q = q.reshape(batch_size, seq_len, 1)
    return q


@jax.jit
def qnetwork_forward_feature_major(obs_t, act_t, packed):
    """Fast path for callers that already store batch-on-lanes layouts.

    obs_t: (obs_dim, N), act_t: (act_dim, N)  ->  (1, N) Q-values.
    Removes the wrapper-side transpose/pad HBM pass entirely.
    """
    n = obs_t.shape[1]
    q_t = _pallas_forward_feature_major(obs_t, act_t, packed, n)
    return q_t[:, :n]


def init_params(key, obs_dim, act_dim, hidden_size=32):
    """Deterministic init mirroring torch.nn.Linear defaults (U(-1/sqrt(fan_in), +))."""
    dims = [(obs_dim + act_dim, hidden_size),
            (hidden_size, hidden_size),
            (hidden_size, hidden_size),
            (hidden_size, 1)]
    params = {}
    for i, (fan_in, fan_out) in enumerate(dims, start=1):
        key, kw, kb = jax.random.split(key, 3)
        bound = 1.0 / jnp.sqrt(jnp.float32(fan_in))
        params[f"w{i}"] = jax.random.uniform(
            kw, (fan_in, fan_out), jnp.float32, -bound, bound)
        params[f"b{i}"] = jax.random.uniform(
            kb, (1, fan_out), jnp.float32, -bound, bound)
    return params


def _reference_forward(obs, act, params):
    """Pure-JAX f32 reference for correctness check."""
    if obs.ndim == 3:
        b, s, _ = obs.shape
        obs = obs.reshape(-1, obs.shape[-1])
        act = act.reshape(-1, act.shape[-1])
        out_shape = (b, s, 1)
    else:
        out_shape = (obs.shape[0], 1)
    x = jnp.concatenate([obs, act], axis=-1)
    h = jnp.maximum(x @ params["w1"] + params["b1"], 0.0)
    h = jnp.maximum(h @ params["w2"] + params["b2"], 0.0)
    h = jnp.maximum(h @ params["w3"] + params["b3"], 0.0)
    q = h @ params["w4"] + params["b4"]
    return q.reshape(out_shape)


if __name__ == "__main__":
    key = jax.random.PRNGKey(0)
    k_obs, k_act, k_params, k_big = jax.random.split(key, 4)

    batch, seq, obs_dim, act_dim, hidden = 2, 8, 4, 2, 32
    obs = jax.random.normal(k_obs, (batch, seq, obs_dim), jnp.float32)
    act = jax.random.normal(k_act, (batch, seq, act_dim), jnp.float32)
    params = init_params(k_params, obs_dim, act_dim, hidden)
    packed = pack_params(params, obs_dim, act_dim, hidden)   # hoisted: once per param update

    # --- small 3-D path, forced through the Pallas kernel --------------------------------
    q = jax.block_until_ready(qnetwork_forward(obs, act, packed, use_pallas=True))
    q_ref = _reference_forward(obs, act, params)
    assert q.shape == (batch, seq, 1), q.shape
    # bf16 matmul operands -> ~1e-2 relative error budget vs. f32 reference
    assert jnp.allclose(q, q_ref, atol=5e-2, rtol=5e-2), "mismatch vs JAX reference (3-D)"

    # --- feature-major fast path (no wrapper transpose), forced through the kernel -------
    q_fm = jax.block_until_ready(qnetwork_forward_feature_major(
        obs.reshape(-1, obs_dim).T, act.reshape(-1, act_dim).T, packed))
    assert q_fm.shape == (1, batch * seq), q_fm.shape
    assert jnp.allclose(q_fm.reshape(-1, 1), q_ref.reshape(-1, 1), atol=5e-2, rtol=5e-2), \
        "mismatch vs JAX reference (feature-major)"

    # --- small 2-D path, auto-bypass (plain XLA dot chain, exact f32) --------------------
    q2 = jax.block_until_ready(
        qnetwork_forward(obs.reshape(-1, obs_dim), act.reshape(-1, act_dim), packed))
    assert q2.shape == (batch * seq, 1), q2.shape
    assert jnp.allclose(q2, q_ref.reshape(-1, 1), atol=1e-5, rtol=1e-5), \
        "mismatch vs JAX reference (2-D bypass)"

    # --- larger batch, auto path (Pallas, 2 blocks so v7x can use both TensorCores) ------
    n_big = 4096
    k1, k2 = jax.random.split(k_big)
    obs_b = jax.random.normal(k1, (n_big, obs_dim), jnp.float32)
    act_b = jax.random.normal(k2, (n_big, act_dim), jnp.float32)
    q_b = jax.block_until_ready(qnetwork_forward(obs_b, act_b, packed))
    q_b_ref = _reference_forward(obs_b, act_b, params)
    assert q_b.shape == (n_big, 1), q_b.shape
    assert jnp.allclose(q_b, q_b_ref, atol=5e-2, rtol=5e-2), "mismatch vs JAX reference (large)"

    print("KERNEL_OK")
</pallas_src>

<mosaic_0001>
module attributes {stable_mosaic.version = 11 : i64} {
  func.func @kernel(%arg0: i32, %arg1: memref<4x128xbf16, #tpu.memory_space<vmem>>, %arg2: memref<2x128xbf16, #tpu.memory_space<vmem>>, %arg3: memref<240x32xf32, #tpu.memory_space<vmem>>, %arg4: memref<1x128xf32, #tpu.memory_space<vmem>>) attributes {dimension_semantics = [#tpu.dimension_semantics<parallel>], iteration_bounds = array<i64: 1>, scalar_prefetch = 0 : i64, scratch_operands = 0 : i64, tpu.core_type = #tpu.core_type<tc>, window_params = [{transform_indices = @transform_0, window_bounds = array<i64: 4, 128>}, {transform_indices = @transform_1, window_bounds = array<i64: 2, 128>}, {pipeline_mode = #tpu.pipeline_mode<synchronous>, transform_indices = @transform_2, window_bounds = array<i64: 240, 32>}, {transform_indices = @transform_3, window_bounds = array<i64: 1, 128>}]} {
    %c0 = arith.constant 0 : index
    %c0_0 = arith.constant 0 : index
    %0 = vector.load %arg1[%c0, %c0_0] : memref<4x128xbf16, #tpu.memory_space<vmem>>, vector<4x128xbf16>
    %c0_1 = arith.constant 0 : index
    %c0_2 = arith.constant 0 : index
    %1 = vector.load %arg2[%c0_1, %c0_2] : memref<2x128xbf16, #tpu.memory_space<vmem>>, vector<2x128xbf16>
    %c0_3 = arith.constant 0 : index
    %c0_4 = arith.constant 0 : index
    %2 = vector.load %arg3[%c0_3, %c0_4] : memref<240x32xf32, #tpu.memory_space<vmem>>, vector<32x4xf32>
    %3 = arith.truncf %2 : vector<32x4xf32> to vector<32x4xbf16>
    %c32 = arith.constant 32 : index
    %c0_5 = arith.constant 0 : index
    %4 = vector.load %arg3[%c32, %c0_5] : memref<240x32xf32, #tpu.memory_space<vmem>>, vector<32x2xf32>
    %5 = arith.truncf %4 : vector<32x2xf32> to vector<32x2xbf16>
    %c64 = arith.constant 64 : index
    %c0_6 = arith.constant 0 : index
    %6 = vector.load %arg3[%c64, %c0_6] : memref<240x32xf32, #tpu.memory_space<vmem>>, vector<32x32xf32>
    %7 = arith.truncf %6 : vector<32x32xf32> to vector<32x32xbf16>
    %c96 = arith.constant 96 : index
    %c0_7 = arith.constant 0 : index
    %8 = vector.load %arg3[%c96, %c0_7] : memref<240x32xf32, #tpu.memory_space<vmem>>, vector<32x32xf32>
    %9 = arith.truncf %8 : vector<32x32xf32> to vector<32x32xbf16>
    %c128 = arith.constant 128 : index
    %c0_8 = arith.constant 0 : index
    %10 = vector.load %arg3[%c128, %c0_8] : memref<240x32xf32, #tpu.memory_space<vmem>>, vector<1x32xf32>
    %11 = arith.truncf %10 : vector<1x32xf32> to vector<1x32xbf16>
    %c136 = arith.constant 136 : index
    %c0_9 = arith.constant 0 : index
    %12 = vector.load %arg3[%c136, %c0_9] : memref<240x32xf32, #tpu.memory_space<vmem>>, vector<32x1xf32>
    %c168 = arith.constant 168 : index
    %c0_10 = arith.constant 0 : index
    %13 = vector.load %arg3[%c168, %c0_10] : memref<240x32xf32, #tpu.memory_space<vmem>>, vector<32x1xf32>
    %c200 = arith.constant 200 : index
    %c0_11 = arith.constant 0 : index
    %14 = vector.load %arg3[%c200, %c0_11] : memref<240x32xf32, #tpu.memory_space<vmem>>, vector<32x1xf32>
    %c232 = arith.constant 232 : index
    %c0_12 = arith.constant 0 : index
    %15 = vector.load %arg3[%c232, %c0_12] : memref<240x32xf32, #tpu.memory_space<vmem>>, vector<1x1xf32>
    %cst = arith.constant dense<0.000000e+00> : vector<32x128xf32>
    %16 = tpu.matmul %3, %0, %cst {dimension_numbers = #tpu.dot_dimension_numbers<[1], [0], [0], [1], [0, 0, 1, 1], [], []>} : vector<32x4xbf16>, vector<4x128xbf16>, vector<32x128xf32> -> vector<32x128xf32>
    %cst_13 = arith.constant dense<0.000000e+00> : vector<32x128xf32>
    %17 = tpu.matmul %5, %1, %cst_13 {dimension_numbers = #tpu.dot_dimension_numbers<[1], [0], [0], [1], [0, 0, 1, 1], [], []>} : vector<32x2xbf16>, vector<2x128xbf16>, vector<32x128xf32> -> vector<32x128xf32>
    %18 = arith.addf %16, %17 : vector<32x128xf32>
    %19 = vector.broadcast %12 : vector<32x1xf32> to vector<32x128xf32>
    %20 = arith.addf %18, %19 : vector<32x128xf32>
    %cst_14 = arith.constant 0.000000e+00 : f32
    %21 = vector.broadcast %cst_14 : f32 to vector<32x128xf32>
    %22 = arith.maximumf %20, %21 : vector<32x128xf32>
    %23 = arith.truncf %22 : vector<32x128xf32> to vector<32x128xbf16>
    %cst_15 = arith.constant dense<0.000000e+00> : vector<32x128xf32>
    %24 = tpu.matmul %7, %23, %cst_15 {dimension_numbers = #tpu.dot_dimension_numbers<[1], [0], [0], [1], [0, 0, 1, 1], [], []>} : vector<32x32xbf16>, vector<32x128xbf16>, vector<32x128xf32> -> vector<32x128xf32>
    %25 = vector.broadcast %13 : vector<32x1xf32> to vector<32x128xf32>
    %26 = arith.addf %24, %25 : vector<32x128xf32>
    %cst_16 = arith.constant 0.000000e+00 : f32
    %27 = vector.broadcast %cst_16 : f32 to vector<32x128xf32>
    %28 = arith.maximumf %26, %27 : vector<32x128xf32>
    %29 = arith.truncf %28 : vector<32x128xf32> to vector<32x128xbf16>
    %cst_17 = arith.constant dense<0.000000e+00> : vector<32x128xf32>
    %30 = tpu.matmul %9, %29, %cst_17 {dimension_numbers = #tpu.dot_dimension_numbers<[1], [0], [0], [1], [0, 0, 1, 1], [], []>} : vector<32x32xbf16>, vector<32x128xbf16>, vector<32x128xf32> -> vector<32x128xf32>
    %31 = vector.broadcast %14 : vector<32x1xf32> to vector<32x128xf32>
    %32 = arith.addf %30, %31 : vector<32x128xf32>
    %cst_18 = arith.constant 0.000000e+00 : f32
    %33 = vector.broadcast %cst_18 : f32 to vector<32x128xf32>
    %34 = arith.maximumf %32, %33 : vector<32x128xf32>
    %35 = arith.truncf %34 : vector<32x128xf32> to vector<32x128xbf16>
    %cst_19 = arith.constant dense<0.000000e+00> : vector<1x128xf32>
    %36 = tpu.matmul %11, %35, %cst_19 {dimension_numbers = #tpu.dot_dimension_numbers<[1], [0], [0], [1], [0, 0, 1, 1], [], []>} : vector<1x32xbf16>, vector<32x128xbf16>, vector<1x128xf32> -> vector<1x128xf32>
    %37 = vector.broadcast %15 : vector<1x1xf32> to vector<1x128xf32>
    %38 = arith.addf %36, %37 : vector<1x128xf32>
    %c0_20 = arith.constant 0 : index
    %c0_21 = arith.constant 0 : index
    %39 = vector.load %arg4[%c0_20, %c0_21] : memref<1x128xf32, #tpu.memory_space<vmem>>, vector<1x128xf32>
    tpu.vector_store %arg4[%c0_20, %c0_21], %38 {strides = array<i32>} : memref<1x128xf32, #tpu.memory_space<vmem>>, vector<1x128xf32>,
    return
  }
  func.func @transform_0(%arg0: i32) -> (i32, i32) {
    %c0_i32 = arith.constant 0 : i32
    %c0_i32_0 = arith.constant 0 : i32
    return %c0_i32, %arg0 : i32, i32
  }
  func.func @transform_1(%arg0: i32) -> (i32, i32) {
    %c0_i32 = arith.constant 0 : i32
    %c0_i32_0 = arith.constant 0 : i32
    return %c0_i32, %arg0 : i32, i32
  }
  func.func @transform_2(%arg0: i32) -> (i32, i32) {
    %c0_i32 = arith.constant 0 : i32
    %c0_i32_0 = arith.constant 0 : i32
    %c0_i32_1 = arith.constant 0 : i32
    return %c0_i32, %c0_i32_0 : i32, i32
  }
  func.func @transform_3(%arg0: i32) -> (i32, i32) {
    %c0_i32 = arith.constant 0 : i32
    %c0_i32_0 = arith.constant 0 : i32
    return %c0_i32, %arg0 : i32, i32
  }
}

</mosaic_0001>

<bundles_post_ra>
// kernel: squeeze.1
= control target key start
LH: loop header
LB: loop body
LE: loop exit
PB: predicated region body
PF: predicated region fallthrough
CT: control target
= control target key end

     0   :  { %s85_s0 = inlined_call_operand.vmem [shape: f32[16], index: 0, kind: input, shape index: {}]   ;;  %s86_s1 = inlined_call_operand.hbm [shape: f32[2,8,1], index: 1, kind: output, shape index: {}]  }
   0x1   :  { %v5_v0 = vld [vmem:[%s85_s0] sm:$0x1] }
   0x2   :  { %2 = vsyncpa [#allocation1], 0  ;;  %6 = vst [vmem:[#allocation3] sm:$0x1] %v5_v0  ;;  %vm8_vm0 = vcmask 64512   ;;  %s58_s0 = smov 120  }
   0x3   :  { %s59_s8 = smov [#allocation0]  }
   0x4   :  { %s26_s9 = sshll.u32 %s59_s8, 4  ;;  %s27_s9 = int_to_ptr.vmem [resolvable:$true] %s26_s9 }
   0x5   :  { %s34_s10 = scalar_lea.vmem %s27_s9, 32  ;;  %p39_p1 = scmp.lt.s32.totalorder %s27_s9, %s27_s9 }
   0x6   :  { %p35_p0 = scmp.ne.s32.totalorder %s27_s9, %s34_s10  ;;  %p40_p2 = scmp.lt.s32.totalorder %s34_s10, %s34_s10 }
   0x8   :  { %p41_p3 = por %p40_p2, %p39_p1 }
   0x9   :  { %v10_v1 = vld [vmem:[#allocation3] sm:$0x1]  }
   0xa   :  { %v7_v2 = vld [vmem:[#allocation3] sm:$0x1]   ;;  %11 = vrot.lane.b32.xlu0 %v10_v1, %s58_s0  ;;  %p42_p4 = pnand %p41_p3, %p35_p0 }
   0xb   :  { %9 = vst.msk [vmem:[#allocation2] sm:$0x1] %vm8_vm0, %v7_v2  }
  0x7c   :  { %v12_v3 = vpop.permute.xlu0 %11  }
  0x7d   :  { %15 = vst.msk [vmem:[#allocation2 + $0x1] sm:$0x1] %vm8_vm0, %v12_v3  }
  0x84   :  { %v19_v4 = vld [vmem:[#allocation2] sm:$0x3] }
  0x85   :  { %21 = vst [vmem:[#allocation0] sm:$0x3] %v19_v4 }
  0x86   :  { %45 = shalt.err (!%p42_p4)
}
  0x87   :  { %s46_s13 = scalar_lea.hbm %s86_s1, 32 }
  0x88   :  { %p47_p5 = scmp.ne.s32.totalorder %s86_s1, %s46_s13  ;;  %p50_p6 = scmp.lt.u32.totalorder %s46_s13, %s86_s1 }
  0x8a   :  { %p52_p7 = pnand %p50_p6, %p47_p5 }
  0x8c   :  { %55 = shalt.err (!%p52_p7)
}
  0x8d   :  { %29 = dma.vmem_to_hbm [thread:$0]  %s27_s9, 32, %s86_s1, [#allocation1]  }
  0x8e   :  { %56 = dma.done.wait [#allocation1], 32  }
  0x8f   :  { %57 = vsyncadd [#allocation1], 4294967264 }
  0x90   :  { %31 = vsyncpa [#allocation1], 1 }

// kernel: qnetwork_forward.1
= control target key start
LH: loop header
LB: loop body
LE: loop exit
PB: predicated region body
PF: predicated region fallthrough
CT: control target
= control target key end

     0   :  { %vm63_vm0 = vcmask 1040384   ;;  %vm56_vm1 = vcmask 15360   ;;  %vm123_vm2 = vcmask 1041408   ;;  %v495_v8 = vmov 0   ;;  %s628_s1 = inlined_call_operand.vmem [shape: bf16[2,128], index: 1, kind: input, shape index: {}]   ;;  %s629_s2 = inlined_call_operand.vmem [shape: f32[240,32], index: 2, kind: input, shape index: {}]   ;;  %s630_s0 = inlined_call_operand.vmem [shape: bf16[4,128], index: 0, kind: input, shape index: {}]   ;;  %s631_s3 = inlined_call_operand.vmem [shape: f32[1,128], index: 3, kind: output, shape index: {}]  }
   0x1   :  { %v16_v0 = vld [vmem:[%s628_s1] sm:$0x1]  ;;  %v24_v2 = vld [vmem:[%s629_s2 + $0x28] sm:$0xff]  ;;  %v25_v5 = vld [vmem:[%s629_s2 + $0x30] sm:$0xff]  ;;  %493 = vset.pattern.permute.xlu0 %v495_v8  ;;  %494 = vset.pattern.permute.xlu1 %v495_v8  ;;  %vm116_vm3 = vcmask 31744   ;;  %vm226_vm4 = vcmask 261120  }
   0x2   :  { %v23_v1 = vld [vmem:[%s629_s2 + $0x20] sm:$0xff]  ;;  %488 = vmatprep.subr.msk.bf16.mxu0 %vm63_vm0, %v16_v0  ;;  %v65_v3 = vsel %vm63_vm0, %v16_v0, 0  ;;  %v26_v6 = vld [vmem:[%s629_s2 + $0x38] sm:$0xff]  ;;  %v18_v11 = vld [vmem:[%s629_s2 + $0x8] sm:$0xff]  ;;  %vm497_vm5 = vmmov 0  }
   0x3   :  { %v27_v4 = vpack.c.bf16 %v24_v2, %v23_v1  ;;  %v15_v7 = vld [vmem:[%s630_s0] sm:$0x3]  ;;  %449 = vmatpush3.bf16.msra.mxu0 %v65_v3  ;;  %v28_v9 = vpack.c.bf16 %v26_v6, %v25_v5  ;;  %v43_v14 = vld [vmem:[%s629_s2 + $0x88] sm:$0xff]  ;;  %v45_v15 = vld [vmem:[%s629_s2 + $0x98] sm:$0xff] }
   0x4   :  { %v17_v10 = vld [vmem:[%s629_s2] sm:$0xff]  ;;  %489 = vmatprep.subr.msk.bf16.mxu0 %vm123_vm2, %v15_v7  ;;  %v125_v12 = vsel %vm123_vm2, %v15_v7, 0  ;;  %178 = vperm.xlu0 %493, %v43_v14   ;;  %v44_v16 = vld [vmem:[%s629_s2 + $0x90] sm:$0xff]  ;;  %v47_v18 = vld [vmem:[%s629_s2 + $0xa8] sm:$0xff]  ;;  %v496_v14 = vmov 0.0  }
   0x5   :  { %450 = vmatprep.mubr.msk.bf16.mxu0 %vm56_vm1, %v27_v4  ;;  %v21_v13 = vpack.c.bf16 %v18_v11, %v17_v10  ;;  %188 = vperm.xlu1 %494, %v45_v15   ;;  %v46_v17 = vld [vmem:[%s629_s2 + $0xa0] sm:$0xff]  ;;  %v19_v19 = vld [vmem:[%s629_s2 + $0x10] sm:$0xff]  ;;  %v20_v20 = vld [vmem:[%s629_s2 + $0x18] sm:$0xff] }
   0x6   :  { %451 = vmatmul.mubr.msk.bf16.vlgmr.msra.gmra.mrb[0].mxu0 %vm56_vm1, %v28_v9  ;;  %v48_v21 = vld [vmem:[%s629_s2 + $0xb0] sm:$0xff]  ;;  %v22_v22 = vpack.c.bf16 %v20_v20, %v19_v19  ;;  %v49_v23 = vld [vmem:[%s629_s2 + $0xb8] sm:$0xff]  ;;  %v50_v24 = vld [vmem:[%s629_s2 + $0xc0] sm:$0xff] }
   0x7   :  { %455 = vmatpush3.bf16.msra.mxu0 %v125_v12  ;;  %456 = vmatprep.mubr.msk.bf16.mxu0 %vm116_vm3, %v21_v13  ;;  %v51_v25 = vld [vmem:[%s629_s2 + $0xc8] sm:$0xff]  ;;  %v52_v26 = vld [vmem:[%s629_s2 + $0xd0] sm:$0xff]  ;;  %v53_v27 = vld [vmem:[%s629_s2 + $0xd8] sm:$0xff] }
   0x8   :  { %183 = vperm.xlu0 %493, %v44_v16   ;;  %v54_v28 = vld [vmem:[%s629_s2 + $0xe0] sm:$0xff]  ;;  %v55_v29 = vld [vmem:[%s629_s2 + $0xe8] sm:$0x1]  ;;  %v31_v51 = vld [vmem:[%s629_s2 + $0x50] sm:$0xff]  ;;  %476 = vmatprep.subr.bf16.mxu0 %v496_v14 }
   0x9   :  { %193 = vperm.xlu1 %494, %v46_v17   ;;  %v29_v30 = vld [vmem:[%s629_s2 + $0x40] sm:$0xff]  ;;  %v30_v31 = vld [vmem:[%s629_s2 + $0x48] sm:$0xff]  ;;  %v32_v52 = vld [vmem:[%s629_s2 + $0x58] sm:$0xff] }
   0xa   :  { %v33_v32 = vpack.c.bf16 %v30_v31, %v29_v30  ;;  %v34_v53 = vpack.c.bf16 %v32_v52, %v31_v51  ;;  %v35_v54 = vld [vmem:[%s629_s2 + $0x60] sm:$0xff]  ;;  %v36_v55 = vld [vmem:[%s629_s2 + $0x68] sm:$0xff]  ;;  %v37_v11 = vld [vmem:[%s629_s2 + $0x70] sm:$0xff] }
   0xb   :  { %v39_v56 = vpack.c.bf16 %v36_v55, %v35_v54  ;;  %v38_v12 = vld [vmem:[%s629_s2 + $0x78] sm:$0xff] }
   0xc   :  { %208 = vperm.xlu0 %493, %v47_v18   ;;  %464 = vmatprep.mubr.msk.bf16.mxu1 %vm226_vm4, %v33_v32  ;;  %v40_v13 = vpack.c.bf16 %v38_v12, %v37_v11 }
   0xd   :  { %213 = vperm.xlu1 %494, %v48_v21  }
  0x10   :  { %218 = vperm.xlu0 %493, %v49_v23  }
  0x11   :  { %223 = vperm.xlu1 %494, %v50_v24  }
  0x12   :  { %457 = vmatmul.mubr.msk.bf16.vlgmr.msra.gmra.mrb[0].mxu0 %vm116_vm3, %v22_v22 }
  0x13   :  { %480 = vmatprep.mubr.msk.bf16.mxu0 %vm497_vm5, %v496_v14 }
  0x14   :  { %290 = vperm.xlu0 %493, %v51_v25  }
  0x15   :  { %295 = vperm.xlu1 %494, %v52_v26  }
  0x18   :  { %300 = vperm.xlu0 %493, %v53_v27  }
  0x19   :  { %305 = vperm.xlu1 %494, %v54_v28  }
  0x1c   :  { %371 = vperm.xlu0 %493, %v55_v29  }
  0x83   :  { %v179_v34 = vpop.permute.xlu0 %178 }
  0x84   :  { %v189_v33 = vpop.permute.xlu1 %188 }
  0x87   :  { %v184_v41 = vpop.permute.xlu0 %183 }
  0x88   :  { %v194_v38 = vpop.permute.xlu1 %193 }
  0x8b   :  { %v209_v57 = vpop.permute.xlu0 %208 }
  0x8c   :  { %v214_v58 = vpop.permute.xlu1 %213 }
  0x8f   :  { %v219_v59 = vpop.permute.xlu0 %218 }
  0x90   :  { %v224_v63 = vpop.permute.xlu1 %223 }
  0x93   :  { %v291_v15 = vpop.permute.xlu0 %290 }
  0x94   :  { %v296_v16 = vpop.permute.xlu1 %295 }
  0x97   :  { %v301_v17 = vpop.permute.xlu0 %300 }
  0x98   :  { %v306_v21 = vpop.permute.xlu1 %305 }
  0xe5   :  { %v458_v35 = vpop.f32.mrb[0].mxu0 }
  0xe6   :  { %v198_v36 = vadd.f32 %v458_v35, %v189_v33  ;;  %v161_v37 = vpop.f32.mrb[1].mxu0  ;;  %v41_v33 = vld [vmem:[%s629_s2 + $0x80] sm:$0x1]  ;;  %v372_v35 = vpop.permute.xlu0 %371 }
  0xe7   :  { %v196_v39 = vadd.f32 %v179_v34, %v161_v37  ;;  %v459_v40 = vpop.f32.mrb[2].mxu0  ;;  %v42_v34 = vpack.c.bf16 %v41_v33, %v41_v33 }
  0xe8   :  { %v199_v42 = vadd.f32 %v459_v40, %v194_v38  ;;  %v164_v43 = vpop.f32.mrb[3].mxu0  ;;  %v202_v45 = vmax.f32 %v198_v36, 0.0 }
  0xe9   :  { %v197_v44 = vadd.f32 %v184_v41, %v164_v43  ;;  %v200_v47 = vmax.f32 %v196_v39, 0.0 }
  0xea   :  { %v203_v46 = vmax.f32 %v199_v42, 0.0 }
  0xeb   :  { %v201_v48 = vmax.f32 %v197_v44, 0.0 }
  0xec   :  { %v205_v49 = vpack.c.bf16 %v203_v46, %v202_v45 }
  0xed   :  { %v204_v50 = vpack.c.bf16 %v201_v48, %v200_v47 }
  0xef   :  { %460 = vmatprep.subr.bf16.mxu1 %v204_v50 }
  0xf0   :  { %461 = vmatpush3.bf16.msra.mxu1 %v204_v50 }
  0xf1   :  { %462 = vmatprep.subr.bf16.mxu1 %v205_v49 }
  0xf4   :  { %463 = vmatpush3.bf16.msra.mxu1 %v205_v49 }
  0xf7   :  { %465 = vmatmul.mubr.msk.bf16.vlgmr.msra.gmra.mrb[0].mxu1 %vm226_vm4, %v34_v53 }
  0xf8   :  { %472 = vmatprep.mubr.msk.bf16.mxu1 %vm226_vm4, %v39_v56 }
 0x1ca   :  { %v466_v60 = vpop.f32.mrb[0].mxu1 }
 0x1cb   :  { %v276_v61 = vadd.f32 %v466_v60, %v219_v59  ;;  %v267_v62 = vpop.f32.mrb[1].mxu1 }
 0x1cc   :  { %v268_v0 = vadd.f32 %v267_v62, %v209_v57  ;;  %v467_v1 = vpop.f32.mrb[2].mxu1 }
 0x1cd   :  { %v279_v2 = vadd.f32 %v467_v1, %v224_v63  ;;  %v270_v3 = vpop.f32.mrb[3].mxu1  ;;  %v284_v5 = vmax.f32 %v276_v61, 0.0 }
 0x1ce   :  { %v271_v4 = vadd.f32 %v270_v3, %v214_v58  ;;  %v282_v7 = vmax.f32 %v268_v0, 0.0 }
 0x1cf   :  { %v285_v6 = vmax.f32 %v279_v2, 0.0 }
 0x1d0   :  { %v283_v8 = vmax.f32 %v271_v4, 0.0 }
 0x1d1   :  { %v287_v9 = vpack.c.bf16 %v285_v6, %v284_v5 }
 0x1d2   :  { %v286_v10 = vpack.c.bf16 %v283_v8, %v282_v7 }
 0x1d4   :  { %468 = vmatprep.subr.bf16.mxu1 %v286_v10 }
 0x1d5   :  { %469 = vmatpush3.bf16.msra.mxu1 %v286_v10 }
 0x1d6   :  { %470 = vmatprep.subr.bf16.mxu1 %v287_v9 }
 0x1d9   :  { %471 = vmatpush3.bf16.msra.mxu1 %v287_v9 }
 0x1dc   :  { %473 = vmatmul.mubr.msk.bf16.vlgmr.msra.gmra.mrb[4].mxu1 %vm226_vm4, %v40_v13 }
 0x2af   :  { %v474_v18 = vpop.f32.mrb[4].mxu1 }
 0x2b0   :  { %v357_v19 = vadd.f32 %v474_v18, %v301_v17  ;;  %v348_v20 = vpop.f32.mrb[5].mxu1 }
 0x2b1   :  { %v349_v22 = vadd.f32 %v348_v20, %v291_v15  ;;  %v475_v23 = vpop.f32.mrb[6].mxu1 }
 0x2b2   :  { %v360_v24 = vadd.f32 %v475_v23, %v306_v21  ;;  %v351_v25 = vpop.f32.mrb[7].mxu1  ;;  %v365_v27 = vmax.f32 %v357_v19, 0.0 }
 0x2b3   :  { %v352_v26 = vadd.f32 %v351_v25, %v296_v16  ;;  %v363_v29 = vmax.f32 %v349_v22, 0.0 }
 0x2b4   :  { %v366_v28 = vmax.f32 %v360_v24, 0.0 }
 0x2b5   :  { %v364_v30 = vmax.f32 %v352_v26, 0.0 }
 0x2b6   :  { %v368_v31 = vpack.c.bf16 %v366_v28, %v365_v27 }
 0x2b7   :  { %v367_v32 = vpack.c.bf16 %v364_v30, %v363_v29 }
 0x2b9   :  { %477 = vmatpush3.bf16.msra.mxu0 %v367_v32 }
 0x2ba   :  { %478 = vmatprep.subr.bf16.mxu0 %v496_v14 }
 0x2bd   :  { %479 = vmatpush3.bf16.msra.mxu0 %v368_v31 }
 0x2c0   :  { %481 = vmatmul.mubr.msk.bf16.vlgmr.msra.gmra.mrb[4].mxu0 %vm226_vm4, %v42_v34 }
 0x393   :  { %v411_v36 = vpop.f32.mrb[4].mxu0 }
 0x394   :  { %v412_v37 = vadd.f32 %v411_v36, %v372_v35  ;;  %v482_v38 = vpop.f32.mrb[5].mxu0 }
 0x395   :  { %v414_v39 = vpop.f32.mrb[6].mxu0 }
 0x396   :  { %417 = vst [vmem:[%s631_s3] sm:$0x1] %v412_v37  ;;  %v483_v40 = vpop.f32.mrb[7].mxu0 }

</bundles_post_ra>
